<compile_context>
chip_gen: v7x
topology: tpu7x:2x2x1
jax: 0.10.0
libtpu: 0.0.40
codegen_flags: <defaults>
</compile_context>

<pallas_src>
import functools

import jax
import jax.numpy as jnp
from jax.experimental import pallas as pl
from jax.experimental.pallas import tpu as pltpu

_LANE = 128
_MAX_ROWS_PER_STEP = 1024            # 1024 rows * 128 lanes = 128K boxes / step
_VMEM_LIMIT_BYTES = 32 * 1024 * 1024  # safe on v5e/v6e/v7x; raises v5e's 16 MiB default


def _round_up(x, m):
    return ((x + m - 1) // m) * m


def _fast_recip(x):
    # EUP approximate reciprocal (otherwise-idle bundle slot) + one Newton
    # refinement step -> ~f32 accuracy without the VPU divide path.
    r = pl.reciprocal(x, approx=True)
    return r * (2.0 - x * r)


def _tile_loss(pred_ref, target_ref, loss_type):
    """Per-box IoU / GIoU loss on dense (TM, 128) coordinate slabs."""
    px, py, pw, ph = pred_ref[0], pred_ref[1], pred_ref[2], pred_ref[3]
    tx, ty, tw, th = target_ref[0], target_ref[1], target_ref[2], target_ref[3]

    # hoisted half extents (reused for both corners)
    phw = pw * 0.5
    phh = ph * 0.5
    thw = tw * 0.5
    thh = th * 0.5

    p_tl_x = px - phw
    p_tl_y = py - phh
    p_br_x = px + phw
    p_br_y = py + phh
    g_tl_x = tx - thw
    g_tl_y = ty - thh
    g_br_x = tx + thw
    g_br_y = ty + thh

    tl_x = jnp.maximum(p_tl_x, g_tl_x)
    tl_y = jnp.maximum(p_tl_y, g_tl_y)
    br_x = jnp.minimum(p_br_x, g_br_x)
    br_y = jnp.minimum(p_br_y, g_br_y)

    area_p = pw * ph
    area_g = tw * th
    # max(., 0) clamps replace the (tl < br) enable mask: identical numerics,
    # fewer VPU compare/convert ops.
    area_i = jnp.maximum(br_x - tl_x, 0.0) * jnp.maximum(br_y - tl_y, 0.0)
    area_u = area_p + area_g - area_i
    iou = area_i * _fast_recip(area_u + 1e-16)

    if loss_type == "iou":
        loss = 1.0 - iou * iou
    elif loss_type == "giou":
        c_tl_x = jnp.minimum(p_tl_x, g_tl_x)
        c_tl_y = jnp.minimum(p_tl_y, g_tl_y)
        c_br_x = jnp.maximum(p_br_x, g_br_x)
        c_br_y = jnp.maximum(p_br_y, g_br_y)
        area_c = (c_br_x - c_tl_x) * (c_br_y - c_tl_y)
        giou = iou - (area_c - area_u) * _fast_recip(jnp.maximum(area_c, 1e-16))
        loss = 1.0 - jnp.clip(giou, -1.0, 1.0)
    else:
        # TODO(synk): 'alpha_iou' branch (pow/atan chain) not implemented.
        raise NotImplementedError(loss_type)
    return loss


def _iou_loss_map_kernel(pred_ref, target_ref, loss_ref, *, loss_type):
    loss_ref[...] = _tile_loss(pred_ref, target_ref, loss_type)


def _iou_loss_reduce_kernel(pred_ref, target_ref, out_ref, *, loss_type, tm):
    # Per-step (8, 128) partial sum: lane-dense store, no loop-carried output,
    # no in-kernel padding mask (handled in the wrapper), "parallel"-friendly.
    loss = _tile_loss(pred_ref, target_ref, loss_type)                 # (tm, 128)
    out_ref[...] = jnp.sum(loss.reshape(tm // 8, 8, _LANE), axis=0)    # (8, 128)


def _to_slab(x, n, n_pad, rows_pad):
    # (N, 4) -> (4, rows_pad, 128) coordinate planes.  With allow_input_fusion
    # set on the pallas_call, XLA is permitted to fold this transpose/pad into
    # the kernel's input fusion instead of materializing an extra HBM copy.
    x = x.T
    if n_pad != n:
        x = jnp.pad(x, ((0, 0), (0, n_pad - n)))
    return x.reshape(4, rows_pad, _LANE)


def iou_loss(pred, target, reduction="none", loss_type="iou"):
    """Matches IOUloss(reduction, loss_type).forward(pred, target)."""
    assert pred.shape[0] == target.shape[0]
    pred = pred.reshape(-1, 4).astype(jnp.float32)
    target = target.reshape(-1, 4).astype(jnp.float32)
    n = pred.shape[0]

    # Full (8,128)-tiled rows; balanced tiles; >=2 steps whenever possible so
    # the "parallel" grid axis feeds both TensorCores on v7x and the pipeline
    # overlaps DMA with compute even for mid-size N.
    rows = _round_up(-(-n // _LANE), 8)
    num_steps = max(2, -(-rows // _MAX_ROWS_PER_STEP))
    tm = max(8, _round_up(-(-rows // num_steps), 8))
    num_steps = -(-rows // tm)
    rows_pad = num_steps * tm
    n_pad = rows_pad * _LANE

    pred_t = _to_slab(pred, n, n_pad, rows_pad)
    target_t = _to_slab(target, n, n_pad, rows_pad)

    flops_per_box = 45 if loss_type == "giou" else 32
    trans_per_box = 2 if loss_type == "giou" else 1

    in_specs = [
        pl.BlockSpec((4, tm, _LANE), lambda i: (0, i, 0)),
        pl.BlockSpec((4, tm, _LANE), lambda i: (0, i, 0)),
    ]
    compiler_params = pltpu.CompilerParams(
        dimension_semantics=("parallel",),
        vmem_limit_bytes=_VMEM_LIMIT_BYTES,
        allow_input_fusion=[True, True],
    )

    if reduction not in ("mean", "sum"):
        # 'none' (or any other string, matching the PyTorch module): per-box loss.
        loss_tiles = pl.pallas_call(
            functools.partial(_iou_loss_map_kernel, loss_type=loss_type),
            out_shape=jax.ShapeDtypeStruct((rows_pad, _LANE), jnp.float32),
            grid_spec=pltpu.PrefetchScalarGridSpec(
                num_scalar_prefetch=0,
                grid=(num_steps,),
                in_specs=in_specs,
                out_specs=pl.BlockSpec((tm, _LANE), lambda i: (i, 0)),
            ),
            compiler_params=compiler_params,
            cost_estimate=pl.CostEstimate(
                flops=flops_per_box * n_pad,
                transcendentals=trans_per_box * n_pad,
                bytes_accessed=36 * n_pad),
        )(pred_t, target_t)
        return loss_tiles.reshape(n_pad)[:n]

    # 'sum' / 'mean': per-step (8,128) partial sums, final reduce in wrapper.
    partials = pl.pallas_call(
        functools.partial(_iou_loss_reduce_kernel, loss_type=loss_type, tm=tm),
        out_shape=jax.ShapeDtypeStruct((num_steps * 8, _LANE), jnp.float32),
        grid_spec=pltpu.PrefetchScalarGridSpec(
            num_scalar_prefetch=0,
            grid=(num_steps,),
            in_specs=in_specs,
            out_specs=pl.BlockSpec((8, _LANE), lambda i: (i, 0)),
        ),
        compiler_params=compiler_params,
        cost_estimate=pl.CostEstimate(
            flops=(flops_per_box + 1) * n_pad,
            transcendentals=trans_per_box * n_pad,
            bytes_accessed=32 * n_pad + num_steps * 8 * _LANE * 4),
    )(pred_t, target_t)

    # Zero-padded boxes contribute exactly 1.0 to the loss in both 'iou' and
    # 'giou' branches, so subtract their count instead of masking in-kernel.
    total = jnp.sum(partials) - jnp.float32(n_pad - n)
    if reduction == "mean":
        return total / jnp.float32(n)
    return total


def _iou_loss_ref(pred, target, reduction="none", loss_type="iou"):
    """Pure-JAX reference mirroring the PyTorch module."""
    pred = pred.reshape(-1, 4).astype(jnp.float32)
    target = target.reshape(-1, 4).astype(jnp.float32)
    tl = jnp.maximum(pred[:, :2] - pred[:, 2:] / 2, target[:, :2] - target[:, 2:] / 2)
    br = jnp.minimum(pred[:, :2] + pred[:, 2:] / 2, target[:, :2] + target[:, 2:] / 2)
    area_p = jnp.prod(pred[:, 2:], axis=1)
    area_g = jnp.prod(target[:, 2:], axis=1)
    en = jnp.prod((tl < br).astype(jnp.float32), axis=1)
    area_i = jnp.prod(br - tl, axis=1) * en
    area_u = area_p + area_g - area_i
    iou = area_i / (area_u + 1e-16)
    if loss_type == "iou":
        loss = 1 - iou ** 2
    elif loss_type == "giou":
        c_tl = jnp.minimum(pred[:, :2] - pred[:, 2:] / 2, target[:, :2] - target[:, 2:] / 2)
        c_br = jnp.maximum(pred[:, :2] + pred[:, 2:] / 2, target[:, :2] + target[:, 2:] / 2)
        area_c = jnp.prod(c_br - c_tl, axis=1)
        giou = iou - (area_c - area_u) / jnp.maximum(area_c, 1e-16)
        loss = 1 - jnp.clip(giou, -1.0, 1.0)
    if reduction == "mean":
        loss = loss.mean()
    elif reduction == "sum":
        loss = loss.sum()
    return loss


if __name__ == "__main__":
    key = jax.random.PRNGKey(0)
    k1, k2, k3, k4 = jax.random.split(key, 4)
    N = 300  # not a multiple of 128 -> exercises lane padding + wrapper correction

    # boxes: centers anywhere in [0, 16), positive widths/heights
    pred = jnp.concatenate(
        [jax.random.uniform(k1, (N, 2)) * 16.0,
         jax.random.uniform(k2, (N, 2)) * 4.0 + 0.5], axis=1)
    target = jnp.concatenate(
        [jax.random.uniform(k3, (N, 2)) * 16.0,
         jax.random.uniform(k4, (N, 2)) * 4.0 + 0.5], axis=1)

    ok = True
    for loss_type in ("iou", "giou"):
        out = jax.block_until_ready(iou_loss(pred, target, "none", loss_type))
        ref = jax.block_until_ready(_iou_loss_ref(pred, target, "none", loss_type))
        if not (out.shape == (N,) and jnp.allclose(out, ref, atol=1e-4, rtol=1e-4)):
            ok = False
        for reduction in ("mean", "sum"):
            out_r = jax.block_until_ready(iou_loss(pred, target, reduction, loss_type))
            ref_r = jax.block_until_ready(_iou_loss_ref(pred, target, reduction, loss_type))
            if not jnp.allclose(out_r, ref_r, atol=1e-3, rtol=1e-4):
                ok = False

    if ok:
        print("KERNEL_OK")
</pallas_src>

<mosaic_0001>
module attributes {stable_mosaic.version = 11 : i64} {
  func.func @_iou_loss_map_kernel(%arg0: i32, %arg1: memref<4x8x128xf32, #tpu.memory_space<vmem>>, %arg2: memref<4x8x128xf32, #tpu.memory_space<vmem>>, %arg3: memref<8x128xf32, #tpu.memory_space<vmem>>) attributes {dimension_semantics = [#tpu.dimension_semantics<parallel>], iteration_bounds = array<i64: 1>, scalar_prefetch = 0 : i64, scratch_operands = 0 : i64, tpu.core_type = #tpu.core_type<tc>, window_params = [{transform_indices = @transform_0, window_bounds = array<i64: 4, 8, 128>}, {transform_indices = @transform_1, window_bounds = array<i64: 4, 8, 128>}, {transform_indices = @transform_2, window_bounds = array<i64: 8, 128>}]} {
    %c0 = arith.constant 0 : index
    %c0_0 = arith.constant 0 : index
    %c0_1 = arith.constant 0 : index
    %0 = vector.load %arg1[%c0, %c0_0, %c0_1] : memref<4x8x128xf32, #tpu.memory_space<vmem>>, vector<1x8x128xf32>
    %1 = vector.shape_cast %0 : vector<1x8x128xf32> to vector<8x128xf32>
    %c1 = arith.constant 1 : index
    %c0_2 = arith.constant 0 : index
    %c0_3 = arith.constant 0 : index
    %2 = vector.load %arg1[%c1, %c0_2, %c0_3] : memref<4x8x128xf32, #tpu.memory_space<vmem>>, vector<1x8x128xf32>
    %3 = vector.shape_cast %2 : vector<1x8x128xf32> to vector<8x128xf32>
    %c2 = arith.constant 2 : index
    %c0_4 = arith.constant 0 : index
    %c0_5 = arith.constant 0 : index
    %4 = vector.load %arg1[%c2, %c0_4, %c0_5] : memref<4x8x128xf32, #tpu.memory_space<vmem>>, vector<1x8x128xf32>
    %5 = vector.shape_cast %4 : vector<1x8x128xf32> to vector<8x128xf32>
    %c3 = arith.constant 3 : index
    %c0_6 = arith.constant 0 : index
    %c0_7 = arith.constant 0 : index
    %6 = vector.load %arg1[%c3, %c0_6, %c0_7] : memref<4x8x128xf32, #tpu.memory_space<vmem>>, vector<1x8x128xf32>
    %7 = vector.shape_cast %6 : vector<1x8x128xf32> to vector<8x128xf32>
    %c0_8 = arith.constant 0 : index
    %c0_9 = arith.constant 0 : index
    %c0_10 = arith.constant 0 : index
    %8 = vector.load %arg2[%c0_8, %c0_9, %c0_10] : memref<4x8x128xf32, #tpu.memory_space<vmem>>, vector<1x8x128xf32>
    %9 = vector.shape_cast %8 : vector<1x8x128xf32> to vector<8x128xf32>
    %c1_11 = arith.constant 1 : index
    %c0_12 = arith.constant 0 : index
    %c0_13 = arith.constant 0 : index
    %10 = vector.load %arg2[%c1_11, %c0_12, %c0_13] : memref<4x8x128xf32, #tpu.memory_space<vmem>>, vector<1x8x128xf32>
    %11 = vector.shape_cast %10 : vector<1x8x128xf32> to vector<8x128xf32>
    %c2_14 = arith.constant 2 : index
    %c0_15 = arith.constant 0 : index
    %c0_16 = arith.constant 0 : index
    %12 = vector.load %arg2[%c2_14, %c0_15, %c0_16] : memref<4x8x128xf32, #tpu.memory_space<vmem>>, vector<1x8x128xf32>
    %13 = vector.shape_cast %12 : vector<1x8x128xf32> to vector<8x128xf32>
    %c3_17 = arith.constant 3 : index
    %c0_18 = arith.constant 0 : index
    %c0_19 = arith.constant 0 : index
    %14 = vector.load %arg2[%c3_17, %c0_18, %c0_19] : memref<4x8x128xf32, #tpu.memory_space<vmem>>, vector<1x8x128xf32>
    %15 = vector.shape_cast %14 : vector<1x8x128xf32> to vector<8x128xf32>
    %cst = arith.constant 5.000000e-01 : f32
    %16 = vector.broadcast %cst : f32 to vector<8x128xf32>
    %17 = arith.mulf %5, %16 : vector<8x128xf32>
    %cst_20 = arith.constant 5.000000e-01 : f32
    %18 = vector.broadcast %cst_20 : f32 to vector<8x128xf32>
    %19 = arith.mulf %7, %18 : vector<8x128xf32>
    %cst_21 = arith.constant 5.000000e-01 : f32
    %20 = vector.broadcast %cst_21 : f32 to vector<8x128xf32>
    %21 = arith.mulf %13, %20 : vector<8x128xf32>
    %cst_22 = arith.constant 5.000000e-01 : f32
    %22 = vector.broadcast %cst_22 : f32 to vector<8x128xf32>
    %23 = arith.mulf %15, %22 : vector<8x128xf32>
    %24 = arith.subf %1, %17 : vector<8x128xf32>
    %25 = arith.subf %3, %19 : vector<8x128xf32>
    %26 = arith.addf %1, %17 : vector<8x128xf32>
    %27 = arith.addf %3, %19 : vector<8x128xf32>
    %28 = arith.subf %9, %21 : vector<8x128xf32>
    %29 = arith.subf %11, %23 : vector<8x128xf32>
    %30 = arith.addf %9, %21 : vector<8x128xf32>
    %31 = arith.addf %11, %23 : vector<8x128xf32>
    %32 = arith.maximumf %24, %28 : vector<8x128xf32>
    %33 = arith.maximumf %25, %29 : vector<8x128xf32>
    %34 = arith.minimumf %26, %30 : vector<8x128xf32>
    %35 = arith.minimumf %27, %31 : vector<8x128xf32>
    %36 = arith.mulf %5, %7 : vector<8x128xf32>
    %37 = arith.mulf %13, %15 : vector<8x128xf32>
    %38 = arith.subf %34, %32 : vector<8x128xf32>
    %cst_23 = arith.constant 0.000000e+00 : f32
    %39 = vector.broadcast %cst_23 : f32 to vector<8x128xf32>
    %40 = arith.maximumf %38, %39 : vector<8x128xf32>
    %41 = arith.subf %35, %33 : vector<8x128xf32>
    %cst_24 = arith.constant 0.000000e+00 : f32
    %42 = vector.broadcast %cst_24 : f32 to vector<8x128xf32>
    %43 = arith.maximumf %41, %42 : vector<8x128xf32>
    %44 = arith.mulf %40, %43 : vector<8x128xf32>
    %45 = arith.addf %36, %37 : vector<8x128xf32>
    %46 = arith.subf %45, %44 : vector<8x128xf32>
    %cst_25 = arith.constant 1.000000e-16 : f32
    %47 = vector.broadcast %cst_25 : f32 to vector<8x128xf32>
    %48 = arith.addf %46, %47 : vector<8x128xf32>
    %49 = tpu.reciprocal %48 {approx = true} : vector<8x128xf32> -> vector<8x128xf32>
    %50 = arith.mulf %48, %49 : vector<8x128xf32>
    %cst_26 = arith.constant 2.000000e+00 : f32
    %51 = vector.broadcast %cst_26 : f32 to vector<8x128xf32>
    %52 = arith.subf %51, %50 : vector<8x128xf32>
    %53 = arith.mulf %49, %52 : vector<8x128xf32>
    %54 = arith.mulf %44, %53 : vector<8x128xf32>
    %55 = arith.mulf %54, %54 : vector<8x128xf32>
    %cst_27 = arith.constant 1.000000e+00 : f32
    %56 = vector.broadcast %cst_27 : f32 to vector<8x128xf32>
    %57 = arith.subf %56, %55 : vector<8x128xf32>
    %c0_28 = arith.constant 0 : index
    %c0_29 = arith.constant 0 : index
    %58 = vector.load %arg3[%c0_28, %c0_29] : memref<8x128xf32, #tpu.memory_space<vmem>>, vector<8x128xf32>
    tpu.vector_store %arg3[%c0_28, %c0_29], %57 {strides = array<i32>} : memref<8x128xf32, #tpu.memory_space<vmem>>, vector<8x128xf32>,
    return
  }
  func.func @transform_0(%arg0: i32) -> (i32, i32, i32) {
    %c0_i32 = arith.constant 0 : i32
    %c0_i32_0 = arith.constant 0 : i32
    %c0_i32_1 = arith.constant 0 : i32
    return %c0_i32, %arg0, %c0_i32_0 : i32, i32, i32
  }
  func.func @transform_1(%arg0: i32) -> (i32, i32, i32) {
    %c0_i32 = arith.constant 0 : i32
    %c0_i32_0 = arith.constant 0 : i32
    %c0_i32_1 = arith.constant 0 : i32
    return %c0_i32, %arg0, %c0_i32_0 : i32, i32, i32
  }
  func.func @transform_2(%arg0: i32) -> (i32, i32) {
    %c0_i32 = arith.constant 0 : i32
    %c0_i32_0 = arith.constant 0 : i32
    return %arg0, %c0_i32 : i32, i32
  }
}

</mosaic_0001>

<bundles_post_ra>
// kernel: tpu_custom_call.1
= control target key start
LH: loop header
LB: loop body
LE: loop exit
PB: predicated region body
PF: predicated region fallthrough
CT: control target
= control target key end

     0   :  { %7 = vsyncpa [#allocation3], 0  ;;  %s239_s0 = inlined_call_operand.hbm [shape: f32[4,8,128], index: 0, kind: input, shape index: {}]   ;;  %s240_s1 = inlined_call_operand.hbm [shape: f32[4,8,128], index: 1, kind: input, shape index: {}]   ;;  %s241_s2 = inlined_call_operand.hbm [shape: f32[8,128], index: 2, kind: output, shape index: {}]  }
   0x1   :  { %8 = vsyncpa [#allocation6], 0 }
   0x2   :  { %9 = vsyncpa [#allocation4], 0  ;;  %s183_s9 = smov [#allocation2]   ;;  %s111_s13 = scalar_lea.hbm %s239_s0, 512 }
   0x3   :  { %s15_s10 = sshll.u32 %s183_s9, 4  ;;  %p112_p0 = scmp.ne.s32.totalorder %s239_s0, %s111_s13  ;;  %s16_s10 = int_to_ptr.vmem [resolvable:$true] %s15_s10 }
   0x4   :  { %p115_p1 = scmp.lt.u32.totalorder %s111_s13, %s239_s0 }
   0x6   :  { %p117_p2 = pnand %p115_p1, %p112_p0 }
   0x8   :  { %120 = shalt.err (!%p117_p2)
}
   0x9   :  { %s121_s18 = scalar_lea.vmem %s16_s10, 512  ;;  %p126_p4 = scmp.lt.s32.totalorder %s16_s10, %s16_s10 }
   0xa   :  { %p122_p3 = scmp.ne.s32.totalorder %s16_s10, %s121_s18  ;;  %p127_p5 = scmp.lt.s32.totalorder %s121_s18, %s121_s18 }
   0xc   :  { %p128_p6 = por %p127_p5, %p126_p4 }
   0xe   :  { %p129_p7 = pnand %p128_p6, %p122_p3 }
  0x10   :  { %132 = shalt.err (!%p129_p7)
}
  0x11   :  { %s184_s19 = smov 128   ;;  %s185_s20 = smov 8  }
  0x12   :  { %21 = dma.hbm_to_vmem [thread:$0]  %s239_s0, 512, %s16_s10, [#allocation3], %s184_s19, %s184_s19, %s185_s20  }
  0x13   :  { %s186_s23 = smov [#allocation5]   ;;  %s133_s27 = scalar_lea.hbm %s240_s1, 512 }
  0x14   :  { %s27_s24 = sshll.u32 %s186_s23, 4  ;;  %p134_p8 = scmp.ne.s32.totalorder %s240_s1, %s133_s27  ;;  %s28_s24 = int_to_ptr.vmem [resolvable:$true] %s27_s24 }
  0x15   :  { %p137_p9 = scmp.lt.u32.totalorder %s133_s27, %s240_s1 }
  0x17   :  { %p139_p10 = pnand %p137_p9, %p134_p8 }
  0x19   :  { %142 = shalt.err (!%p139_p10)
}
  0x1a   :  { %s143_s4 = scalar_lea.vmem %s28_s24, 512  ;;  %p148_p12 = scmp.lt.s32.totalorder %s28_s24, %s28_s24 }
  0x1b   :  { %p144_p11 = scmp.ne.s32.totalorder %s28_s24, %s143_s4  ;;  %p149_p13 = scmp.lt.s32.totalorder %s143_s4, %s143_s4 }
  0x1d   :  { %p150_p0 = por %p149_p13, %p148_p12 }
  0x1f   :  { %p151_p1 = pnand %p150_p0, %p144_p11 }
  0x21   :  { %154 = shalt.err (!%p151_p1)
}
  0x22   :  { %33 = dma.hbm_to_vmem [thread:$0]  %s240_s1, 512, %s28_s24, [#allocation6], %s184_s19, %s184_s19, %s185_s20  }
  0x23   :  { %177 = dma.done.wait [#allocation3], 512  }
  0x24   :  { %178 = vsyncadd [#allocation3], 4294966784 }
  0x25   :  { %179 = dma.done.wait [#allocation6], 512  }
  0x26   :  { %180 = vsyncadd [#allocation6], 4294966784  ;;  %v40_v0 = vld [vmem:[#allocation2] sm:$0xff]  ;;  %v44_v1 = vld [vmem:[#allocation2 + $0x10] sm:$0xff]  ;;  %s187_s1 = smov [#allocation7]  }
  0x27   :  { %v42_v2 = vld [vmem:[#allocation2 + $0x8] sm:$0xff]  ;;  %v46_v3 = vld [vmem:[#allocation2 + $0x18] sm:$0xff]  ;;  %v47_v4 = vld [vmem:[#allocation5] sm:$0xff]  ;;  %v54_v5 = vmul.f32 0.5, %v44_v1  ;;  %s94_s6 = sshll.u32 %s187_s1, 4  ;;  %s95_s6 = int_to_ptr.vmem [resolvable:$true] %s94_s6 }
  0x28   :  { %v49_v6 = vld [vmem:[#allocation5 + $0x8] sm:$0xff]  ;;  %v51_v7 = vld [vmem:[#allocation5 + $0x10] sm:$0xff]  ;;  %v53_v8 = vld [vmem:[#allocation5 + $0x18] sm:$0xff]  ;;  %v55_v9 = vmul.f32 0.5, %v46_v3  ;;  %v70_v20 = vmul.f32 %v46_v3, %v44_v1  ;;  %s155_s7 = scalar_lea.vmem %s95_s6, 128  ;;  %p160_p3 = scmp.lt.s32.totalorder %s95_s6, %s95_s6 }
  0x29   :  { %v56_v10 = vmul.f32 0.5, %v51_v7  ;;  %v57_v11 = vmul.f32 0.5, %v53_v8  ;;  %v58_v12 = vsub.f32 %v40_v0, %v54_v5  ;;  %v60_v13 = vadd.f32 %v54_v5, %v40_v0  ;;  %p156_p2 = scmp.ne.s32.totalorder %s95_s6, %s155_s7  ;;  %p161_p4 = scmp.lt.s32.totalorder %s155_s7, %s155_s7 }
  0x2a   :  { %v59_v14 = vsub.f32 %v42_v2, %v55_v9  ;;  %v61_v15 = vadd.f32 %v55_v9, %v42_v2  ;;  %v71_v21 = vmul.f32 %v53_v8, %v51_v7 }
  0x2b   :  { %v62_v16 = vsub.f32 %v47_v4, %v56_v10  ;;  %v63_v17 = vsub.f32 %v49_v6, %v57_v11  ;;  %v64_v18 = vadd.f32 %v56_v10, %v47_v4  ;;  %v65_v19 = vadd.f32 %v57_v11, %v49_v6  ;;  %p162_p5 = por %p161_p4, %p160_p3 }
  0x2c   :  { %v77_v30 = vadd.f32 %v71_v21, %v70_v20 }
  0x2d   :  { %v66_v22 = vmax.f32 %v58_v12, %v62_v16  ;;  %v67_v23 = vmax.f32 %v59_v14, %v63_v17  ;;  %v68_v24 = vmin.f32 %v60_v13, %v64_v18  ;;  %v69_v25 = vmin.f32 %v61_v15, %v65_v19  ;;  %p163_p6 = pnand %p162_p5, %p156_p2 }
  0x2f   :  { %v72_v26 = vsub.f32 %v68_v24, %v66_v22  ;;  %v74_v27 = vsub.f32 %v69_v25, %v67_v23 }
  0x31   :  { %v73_v28 = vmax.f32 %v72_v26, 0.0  ;;  %v75_v29 = vmax.f32 %v74_v27, 0.0 }
  0x33   :  { %v76_v31 = vmul.f32 %v75_v29, %v73_v28 }
  0x35   :  { %v78_v32 = vsub.f32 %v77_v30, %v76_v31 }
  0x37   :  { %v79_v33 = vadd.f32 1e-16, %v78_v32 }
  0x39   :  { %109 = vrcp.f32 %v79_v33 }
  0x43   :  { %v110_v34 = vpop.eup %109 }
  0x44   :  { %v81_v35 = vmul.f32 %v110_v34, %v79_v33 }
  0x46   :  { %v82_v36 = vsub.f32 2.0, %v81_v35 }
  0x48   :  { %v83_v37 = vmul.f32 %v110_v34, %v82_v36 }
  0x4a   :  { %v84_v38 = vmul.f32 %v83_v37, %v76_v31 }
  0x4c   :  { %v85_v39 = vmul.f32 %v84_v38, %v84_v38 }
  0x4e   :  { %v86_v40 = vsub.f32 1.0, %v85_v39 }
  0x50   :  { %87 = vst [vmem:[#allocation7] sm:$0xff] %v86_v40 }
  0x51   :  { %166 = shalt.err (!%p163_p6)
}
  0x52   :  { %s167_s10 = scalar_lea.hbm %s241_s2, 128 }
  0x53   :  { %p168_p7 = scmp.ne.s32.totalorder %s241_s2, %s167_s10  ;;  %p171_p8 = scmp.lt.u32.totalorder %s167_s10, %s241_s2 }
  0x55   :  { %p173_p9 = pnand %p171_p8, %p168_p7 }
  0x57   :  { %176 = shalt.err (!%p173_p9)
}
  0x58   :  { %97 = dma.vmem_to_hbm [thread:$0]  %s95_s6, 128, %s241_s2, [#allocation4]  }
  0x59   :  { %181 = dma.done.wait [#allocation4], 128  }
  0x5a   :  { %182 = vsyncadd [#allocation4], 4294967168 }
  0x5b   :  { %101 = vsyncpa [#allocation3], 1 }
  0x5c   :  { %102 = vsyncpa [#allocation6], 1 }
  0x5d   :  { %103 = vsyncpa [#allocation4], 1 }

</bundles_post_ra>
